<compile_context>
chip_gen: v7x
topology: tpu7x:2x2x1
jax: 0.10.0
libtpu: 0.0.40
codegen_flags: <defaults>
</compile_context>

<pallas_src>
import functools

import numpy as np
import jax
import jax.numpy as jnp
from jax import lax
from jax.experimental import pallas as pl
from jax.experimental.pallas import tpu as pltpu

_SCALE = 10.0 / np.log(10.0)       # matches self.scale = 10 / np.log(10)
_EPS = 1e-8
_LANE = 128
_TILE_BYTES = 4 * 1024 * 1024      # per-input VMEM tile budget (f32 bytes)
_COEF_Y = (65.481, 128.553, 24.966)


def _psnr_loss_kernel(pred_ref, target_ref, out_ref, acc_ref, *,
                      tr, rows_valid, need_mask, inv_n, eps, to_y):
    """Grid = (batch, k).  Block: (1, TR, 128) or (1, 3, TR, 128) for toY.

    acc_ref: (8, 128) f32 scratch accumulator persisting across the k axis.
    """
    k = pl.program_id(1)
    nk = pl.num_programs(1)

    @pl.when(k == 0)
    def _init():
        acc_ref[...] = jnp.zeros_like(acc_ref)

    if to_y:
        # Fused RGB->Y: y = (c0*r + c1*g + c2*b + 16) / 255 computed per tile
        # in registers (no HBM round trip for the intermediate Y tensors).
        c0, c1, c2 = _COEF_Y
        yp = (c0 * pred_ref[0, 0].astype(jnp.float32)
              + c1 * pred_ref[0, 1].astype(jnp.float32)
              + c2 * pred_ref[0, 2].astype(jnp.float32) + 16.0) / 255.0
        yt = (c0 * target_ref[0, 0].astype(jnp.float32)
              + c1 * target_ref[0, 1].astype(jnp.float32)
              + c2 * target_ref[0, 2].astype(jnp.float32) + 16.0) / 255.0
        d = yp - yt                                       # (TR, 128)
    else:
        d = pred_ref[0].astype(jnp.float32) - target_ref[0].astype(jnp.float32)
    sq = d * d                                            # pure VPU

    if need_mask:
        # Ragged last tile: rows >= rows_valid hold unspecified data -> zero them.
        rows = lax.broadcasted_iota(jnp.int32, (tr, 1), 0) + k * tr
        sq = jnp.where(rows < rows_valid, sq, 0.0)

    # Fold TR rows into one (8, 128) vreg-shaped partial sum: tr/8 - 1 vector
    # adds, no per-step cross-lane reduction.
    acc_ref[...] += sq.reshape(tr // 8, 8, _LANE).sum(axis=0)

    @pl.when(k == nk - 1)
    def _finish():
        total = jnp.sum(acc_ref[...], axis=(0, 1), keepdims=True)  # one XLU reduce
        logv = jnp.log(total * inv_n + eps)                        # one EUP op
        out_ref[...] = jnp.broadcast_to(logv.reshape(1, 1, 1), (1, 8, _LANE))


def psnr_loss(pred, target, *, loss_weight=1.0, toY=False, tile_rows=None):
    """PSNRLoss.forward. pred/target: (B, C, H, W)."""
    assert pred.ndim == 4 and target.ndim == 4
    b, c, h, w = pred.shape

    if toY:
        assert c == 3, "toY path requires 3 input channels"
        n = h * w                                 # elements per sample after RGB->Y
        p = pred.reshape(b, 3, h * w)
        t = target.reshape(b, 3, h * w)
    else:
        n = c * h * w
        p = pred.reshape(b, n)
        t = target.reshape(b, n)

    # Pad flattened spatial axis to a lane multiple (zeros contribute nothing:
    # pred and target pads are identical, so the diff is exactly zero).
    n128 = pl.cdiv(n, _LANE) * _LANE
    if n128 != n:
        pad = [(0, 0)] * (p.ndim - 1) + [(0, n128 - n)]
        p = jnp.pad(p, pad)
        t = jnp.pad(t, pad)
    r = n128 // _LANE

    if toY:
        p = p.reshape(b, 3, r, _LANE)
        t = t.reshape(b, 3, r, _LANE)
    else:
        p = p.reshape(b, r, _LANE)
        t = t.reshape(b, r, _LANE)

    # Rows come in sublane groups of 8 for full-vreg accumulation.
    r8 = pl.cdiv(r, 8) * 8
    if r8 != r:
        pad = [(0, 0)] * (p.ndim - 2) + [(0, r8 - r), (0, 0)]
        p = jnp.pad(p, pad)
        t = jnp.pad(t, pad)

    # Auto-size the tile to ~_TILE_BYTES per input (double-buffered x 2 inputs
    # stays well under the 32 MiB scoped VMEM default on all chips).
    c_blk = 3 if toY else 1
    if tile_rows is None:
        rows_budget = _TILE_BYTES // (c_blk * _LANE * 4)
        tile_rows = max(8, (rows_budget // 8) * 8)
    assert tile_rows % 8 == 0 and tile_rows > 0
    tr = min(tile_rows, r8)                 # multiple of 8 by construction
    grid_k = pl.cdiv(r8, tr)
    need_mask = (r8 % tr) != 0              # only the truly ragged case pays for masking

    kernel = functools.partial(
        _psnr_loss_kernel,
        tr=tr,
        rows_valid=r8,
        need_mask=need_mask,
        inv_n=1.0 / float(n),
        eps=float(_EPS),
        to_y=toY,
    )

    if toY:
        in_block = (1, 3, tr, _LANE)
        in_map = lambda bi, ki: (bi, 0, ki, 0)
    else:
        in_block = (1, tr, _LANE)
        in_map = lambda bi, ki: (bi, ki, 0)

    per_sample = pl.pallas_call(
        kernel,
        out_shape=jax.ShapeDtypeStruct((b, 8, _LANE), jnp.float32),
        grid_spec=pltpu.PrefetchScalarGridSpec(
            num_scalar_prefetch=0,
            grid=(b, grid_k),
            in_specs=[
                pl.BlockSpec(in_block, in_map),
                pl.BlockSpec(in_block, in_map),
            ],
            out_specs=pl.BlockSpec((1, 8, _LANE), lambda bi, ki: (bi, 0, 0)),
            scratch_shapes=[pltpu.VMEM((8, _LANE), jnp.float32)],
        ),
        compiler_params=pltpu.CompilerParams(
            dimension_semantics=("parallel", "arbitrary"),
            vmem_limit_bytes=32 * 1024 * 1024,
        ),
    )(p, t)

    per_sample_log = per_sample[:, 0, 0]               # (B,) log(mse + eps)
    return (loss_weight * _SCALE) * jnp.mean(per_sample_log)


def psnr_loss_ref(pred, target, *, loss_weight=1.0, toY=False):
    """Pure-JAX reference mirroring the PyTorch module."""
    if toY:
        coef = jnp.array([65.481, 128.553, 24.966], dtype=jnp.float32).reshape(1, 3, 1, 1)
        pred = ((pred * coef).sum(axis=1, keepdims=True) + 16.0) / 255.0
        target = ((target * coef).sum(axis=1, keepdims=True) + 16.0) / 255.0
    mse = jnp.mean((pred - target) ** 2, axis=(1, 2, 3))
    return loss_weight * _SCALE * jnp.mean(jnp.log(mse + _EPS))


if __name__ == "__main__":
    key = jax.random.PRNGKey(0)

    # 1) Base case: B=2, C=4, H=W=16.
    k1, k2, key = jax.random.split(key, 3)
    pred = jax.random.uniform(k1, (2, 4, 16, 16), dtype=jnp.float32)
    target = jax.random.uniform(k2, (2, 4, 16, 16), dtype=jnp.float32)
    out = jax.block_until_ready(psnr_loss(pred, target, loss_weight=1.0, toY=False))
    ref = psnr_loss_ref(pred, target, loss_weight=1.0, toY=False)
    np.testing.assert_allclose(np.asarray(out), np.asarray(ref), rtol=1e-5, atol=1e-5)

    # 2) Fused toY path (C=3) — also exercises the row-padding branch.
    k1, k2, key = jax.random.split(key, 3)
    pred = jax.random.uniform(k1, (2, 3, 16, 16), dtype=jnp.float32)
    target = jax.random.uniform(k2, (2, 3, 16, 16), dtype=jnp.float32)
    out = jax.block_until_ready(psnr_loss(pred, target, loss_weight=0.5, toY=True))
    ref = psnr_loss_ref(pred, target, loss_weight=0.5, toY=True)
    np.testing.assert_allclose(np.asarray(out), np.asarray(ref), rtol=1e-5, atol=1e-5)

    # 3) Multi-step reduction grid + ragged-tile mask (small tile_rows to force it).
    k1, k2, key = jax.random.split(key, 3)
    pred = jax.random.uniform(k1, (2, 3, 32, 32), dtype=jnp.float32)    # r8 = 24, tr = 16
    target = jax.random.uniform(k2, (2, 3, 32, 32), dtype=jnp.float32)
    out = jax.block_until_ready(psnr_loss(pred, target, loss_weight=1.0, toY=False, tile_rows=16))
    ref = psnr_loss_ref(pred, target, loss_weight=1.0, toY=False)
    np.testing.assert_allclose(np.asarray(out), np.asarray(ref), rtol=1e-5, atol=1e-5)

    # 4) Fused toY + lane padding + multi-step grid + ragged mask.
    k1, k2, key = jax.random.split(key, 3)
    pred = jax.random.uniform(k1, (2, 3, 50, 50), dtype=jnp.float32)    # r8 = 24, tr = 16
    target = jax.random.uniform(k2, (2, 3, 50, 50), dtype=jnp.float32)
    out = jax.block_until_ready(psnr_loss(pred, target, loss_weight=1.0, toY=True, tile_rows=16))
    ref = psnr_loss_ref(pred, target, loss_weight=1.0, toY=True)
    np.testing.assert_allclose(np.asarray(out), np.asarray(ref), rtol=1e-5, atol=1e-5)

    print("KERNEL_OK")
</pallas_src>

<mosaic_0001>
module attributes {stable_mosaic.version = 11 : i64} {
  func.func @_psnr_loss_kernel(%arg0: i32, %arg1: i32, %arg2: memref<1x8x128xf32, #tpu.memory_space<vmem>>, %arg3: memref<1x8x128xf32, #tpu.memory_space<vmem>>, %arg4: memref<1x8x128xf32, #tpu.memory_space<vmem>>, %arg5: memref<8x128xf32, #tpu.memory_space<vmem>>) attributes {dimension_semantics = [#tpu.dimension_semantics<parallel>, #tpu.dimension_semantics<arbitrary>], iteration_bounds = array<i64: 2, 1>, scalar_prefetch = 0 : i64, scratch_operands = 1 : i64, tpu.core_type = #tpu.core_type<tc>, window_params = [{transform_indices = @transform_0, window_bounds = array<i64: 1, 8, 128>}, {transform_indices = @transform_1, window_bounds = array<i64: 1, 8, 128>}, {transform_indices = @transform_2, window_bounds = array<i64: 1, 8, 128>}]} {
    %c0_i32 = arith.constant 0 : i32
    %0 = arith.cmpi eq, %arg1, %c0_i32 : i32
    %1 = arith.extui %0 : i1 to i32
    %c0_i32_0 = arith.constant 0 : i32
    %2 = arith.cmpi ne, %1, %c0_i32_0 : i32
    scf.if %2 {
      %cst_12 = arith.constant 0.000000e+00 : f32
      %17 = vector.broadcast %cst_12 : f32 to vector<8x128xf32>
      %c0_13 = arith.constant 0 : index
      %c0_14 = arith.constant 0 : index
      %18 = vector.load %arg5[%c0_13, %c0_14] : memref<8x128xf32, #tpu.memory_space<vmem>>, vector<8x128xf32>
      tpu.vector_store %arg5[%c0_13, %c0_14], %17 {strides = array<i32>} : memref<8x128xf32, #tpu.memory_space<vmem>>, vector<8x128xf32>,
    } else {
    }
    %c0 = arith.constant 0 : index
    %c0_1 = arith.constant 0 : index
    %c0_2 = arith.constant 0 : index
    %3 = vector.load %arg2[%c0, %c0_1, %c0_2] : memref<1x8x128xf32, #tpu.memory_space<vmem>>, vector<1x8x128xf32>
    %4 = vector.shape_cast %3 : vector<1x8x128xf32> to vector<8x128xf32>
    %c0_3 = arith.constant 0 : index
    %c0_4 = arith.constant 0 : index
    %c0_5 = arith.constant 0 : index
    %5 = vector.load %arg3[%c0_3, %c0_4, %c0_5] : memref<1x8x128xf32, #tpu.memory_space<vmem>>, vector<1x8x128xf32>
    %6 = vector.shape_cast %5 : vector<1x8x128xf32> to vector<8x128xf32>
    %7 = arith.subf %4, %6 : vector<8x128xf32>
    %8 = arith.mulf %7, %7 : vector<8x128xf32>
    %c0_6 = arith.constant 0 : index
    %c0_7 = arith.constant 0 : index
    %9 = vector.load %arg5[%c0_6, %c0_7] : memref<8x128xf32, #tpu.memory_space<vmem>>, vector<8x128xf32>
    %10 = vector.shape_cast %8 : vector<8x128xf32> to vector<1x8x128xf32>
    %cst = arith.constant dense<0.000000e+00> : vector<8x128xf32>
    %11 = vector.multi_reduction <add>, %10, %cst [0] : vector<1x8x128xf32> to vector<8x128xf32>
    %12 = arith.addf %9, %11 : vector<8x128xf32>
    %c0_8 = arith.constant 0 : index
    %c0_9 = arith.constant 0 : index
    %13 = vector.load %arg5[%c0_8, %c0_9] : memref<8x128xf32, #tpu.memory_space<vmem>>, vector<8x128xf32>
    tpu.vector_store %arg5[%c0_8, %c0_9], %12 {strides = array<i32>} : memref<8x128xf32, #tpu.memory_space<vmem>>, vector<8x128xf32>,
    %c0_i32_10 = arith.constant 0 : i32
    %14 = arith.cmpi eq, %arg1, %c0_i32_10 : i32
    %15 = arith.extui %14 : i1 to i32
    %c0_i32_11 = arith.constant 0 : i32
    %16 = arith.cmpi ne, %15, %c0_i32_11 : i32
    scf.if %16 {
      %c0_12 = arith.constant 0 : index
      %c0_13 = arith.constant 0 : index
      %17 = vector.load %arg5[%c0_12, %c0_13] : memref<8x128xf32, #tpu.memory_space<vmem>>, vector<8x128xf32>
      %18 = vector.shape_cast %17 : vector<8x128xf32> to vector<1x8x128xf32>
      %cst_14 = arith.constant dense<0.000000e+00> : vector<1xf32>
      %19 = vector.multi_reduction <add>, %18, %cst_14 [1, 2] : vector<1x8x128xf32> to vector<1xf32>
      %20 = vector.shape_cast %19 : vector<1xf32> to vector<1x1x1xf32>
      %21 = vector.extract %20[0, 0, 0] : f32 from vector<1x1x1xf32>
      %22 = vector.broadcast %21 : f32 to vector<1x1xf32>
      %cst_15 = arith.constant 9.765625E-4 : f32
      %23 = vector.broadcast %cst_15 : f32 to vector<1x1xf32>
      %24 = arith.mulf %22, %23 : vector<1x1xf32>
      %cst_16 = arith.constant 9.99999993E-9 : f32
      %25 = vector.broadcast %cst_16 : f32 to vector<1x1xf32>
      %26 = arith.addf %24, %25 : vector<1x1xf32>
      %27 = math.log %26 : vector<1x1xf32>
      %28 = vector.shape_cast %27 : vector<1x1xf32> to vector<1x1x1xf32>
      %29 = vector.shape_cast %28 : vector<1x1x1xf32> to vector<1x1x1xf32>
      %30 = vector.broadcast %29 : vector<1x1x1xf32> to vector<1x8x128xf32>
      %c0_17 = arith.constant 0 : index
      %c0_18 = arith.constant 0 : index
      %c0_19 = arith.constant 0 : index
      %31 = vector.load %arg4[%c0_17, %c0_18, %c0_19] : memref<1x8x128xf32, #tpu.memory_space<vmem>>, vector<1x8x128xf32>
      tpu.vector_store %arg4[%c0_17, %c0_18, %c0_19], %30 {strides = array<i32>} : memref<1x8x128xf32, #tpu.memory_space<vmem>>, vector<1x8x128xf32>,
    } else {
    }
    return
  }
  func.func @transform_0(%arg0: i32, %arg1: i32) -> (i32, i32, i32) {
    %c0_i32 = arith.constant 0 : i32
    %c0_i32_0 = arith.constant 0 : i32
    return %arg0, %arg1, %c0_i32 : i32, i32, i32
  }
  func.func @transform_1(%arg0: i32, %arg1: i32) -> (i32, i32, i32) {
    %c0_i32 = arith.constant 0 : i32
    %c0_i32_0 = arith.constant 0 : i32
    return %arg0, %arg1, %c0_i32 : i32, i32, i32
  }
  func.func @transform_2(%arg0: i32, %arg1: i32) -> (i32, i32, i32) {
    %c0_i32 = arith.constant 0 : i32
    %c0_i32_0 = arith.constant 0 : i32
    %c0_i32_1 = arith.constant 0 : i32
    return %arg0, %c0_i32, %c0_i32_0 : i32, i32, i32
  }
}

</mosaic_0001>

<bundles_post_ra>
// kernel: tpu_custom_call.1
= control target key start
LH: loop header
LB: loop body
LE: loop exit
PB: predicated region body
PF: predicated region fallthrough
CT: control target
= control target key end

     0   :  { %7 = vsyncpa [#allocation4], 0  ;;  %s841_s0 = inlined_call_operand.hbm [shape: f32[2,8,128], index: 0, kind: input, shape index: {}]   ;;  %s842_s1 = inlined_call_operand.hbm [shape: f32[2,8,128], index: 1, kind: input, shape index: {}]   ;;  %s843_s2 = inlined_call_operand.hbm [shape: f32[2,8,128], index: 2, kind: output, shape index: {}]  }
   0x1   :  { %9 = vsyncpa [#allocation4 + $0x1], 0 }
   0x2   :  { %10 = vsyncpa [#allocation7], 0 }
   0x3   :  { %12 = vsyncpa [#allocation7 + $0x1], 0 }
   0x4   :  { %13 = vsyncpa [#allocation5], 0 }
   0x5   :  { %15 = vsyncpa [#allocation5 + $0x1], 0  ;;  %s616_s9 = smov 0   ;;  %s618_s10 = smov 0  }
   0x6   :  { %s620_s11 = smov 0   ;;  %s622_s12 = smov 0  }
   0x7   :  { %s624_s13 = smov 0   ;;  %s626_s14 = smov 0  }
   0x8 LB: > { %s363_s15 = sadd.s32 4294967295, %s596_s14   ;;  %s364_s16 = sadd.s32 4294967294, %s596_s14   ;;  %s596_s14 = sphi %s626_s14, %s21_s14   ;;  %s592_s13 = sphi %s624_s13, %s863_s13   ;;  %s588_s12 = sphi %s622_s12, %s862_s12   ;;  %s584_s11 = sphi %s620_s11, %s861_s11   ;;  %s580_s10 = sphi %s618_s10, %s860_s10   ;;  %s576_s9 = sphi %s616_s9, %s859_s9  }
   0x9   : > { %s33_s17 = sadd.s32 1, %s592_s13  ;;  %s42_s18 = sadd.s32 1, %s584_s11 }
   0xa   : > { %p35_p0 = scmp.ge.s32.totalorder %s33_s17, 2  ;;  %p49_p1 = scmp.ne.s32.totalorder %s584_s11, %s580_s10 }
   0xb   : > { %p50_p2 = scmp.eq.s32.totalorder %s596_s14, 0  ;;  %p55_p3 = scmp.ne.s32.totalorder %s580_s10, %s576_s9 }
   0xc   : > { %s865_s17 = smov (%p35_p0, %s33_s17), 0  ;;  %p56_p5 = scmp.eq.s32.totalorder %s363_s15, 0 }
   0xd   : > { %p657_p4 = por %p50_p2, %p49_p1  ;;  %s37_s20 = ssub.s32 %s592_s13, %s865_s17 }
   0xe   : > { %p107_p6 = scmp.eq.s32.totalorder %s363_s15, 1  ;;  %p40_p7 = scmp.eq.s32.totalorder %s37_s20, 0 }
   0xf   : > { %p663_p8 = por %p56_p5, %p55_p3  ;;  %p113_p10 = scmp.eq.s32.totalorder %s364_s16, 1 }
  0x10   : > { %p667_p9 = por %p107_p6, %p49_p1  ;;  %p398_p13 = scmp.lt.s32.totalorder %s596_s14, 2 }
  0x11   : > { %s847_s21 = scalar_select %p663_p8, 1, 0 }
  0x12   : > { %s848_s22 = scalar_select %p667_p9, 1, 0 }
  0x13   : > { %s672_s23 = scalar_select %p40_p7, %s584_s11, %s42_s18  }
  0x14   : > { %p674_p11 = por %p113_p10, %p55_p3  ;;  %s681_s25 = sand.u32 1, %s584_s11  }
  0x15   : > { %s367_s26 = sshll.u32 %s681_s25, 3  ;;  %s368_s27 = sshll.u32 %s592_s13, 7 }
  0x16   : > { %s849_s24 = scalar_select %p674_p11, 1, 0 }
  0x17   : > { %s690_s30 = scalar_lea.hbm %s841_s0, %s368_s27  ;;  %s137_s3 = scalar_lea.vmem [#allocation3], %s367_s26 }
  0x18   : > { %s145_s4 = sshll.u32 %s137_s3, 4  ;;  %p698_p0 = pnand %p398_p13, %p657_p4  ;;  %s694_s4 = int_to_ptr.vmem [resolvable:$true] %s145_s4 }
  0x19   : > { %s134_s6 = scalar_lea.sflag [#allocation4], %s681_s25  ;;  %s450_s7 = scalar_lea.hbm %s690_s30, 128 }
  0x1a   : > { %p451_p3 = scmp.ne.s32.totalorder %s690_s30, %s450_s7  ;;  %p452_p5 = pneg %p698_p0 }
  0x1b   : > { %s455_s16 = scalar_lea.hbm %s841_s0, 256  ;;  %p456_p4 = scmp.lt.u32.totalorder %s690_s30, %s841_s0 }
  0x1c   : > { %p453_p6 = pnand %p452_p5, %p451_p3  ;;  %p457_p10 = scmp.lt.u32.totalorder %s455_s16, %s450_s7 }
  0x1d   : > { %p459_p12 = scmp.lt.u32.totalorder %s450_s7, %s690_s30 }
  0x1e   : > { %p454_p7 = pneg %p453_p6  ;;  %p458_p13 = por %p457_p10, %p456_p4 }
  0x20   : > { %p460_p1 = por %p459_p12, %p458_p13 }
  0x22   : > { %p461_p2 = pnand %p460_p1, %p454_p7 }
  0x24   : > { %464 = shalt.err (!%p461_p2)
}
  0x25   : > { %s465_s20 = scalar_lea.vmem %s694_s4, 128  ;;  %s598_s28 = smov [#allocation3]  }
  0x26   : > { %p466_p3 = scmp.ne.s32.totalorder %s694_s4, %s465_s20  ;;  %s470_s29 = sshll.u32 %s598_s28, 4  ;;  %s471_s29 = int_to_ptr.vmem [resolvable:$false] %s470_s29 }
  0x27   : > { %s472_s3 = scalar_lea.vmem %s471_s29, 256  ;;  %p473_p9 = scmp.lt.s32.totalorder %s694_s4, %s471_s29 }
  0x28   : > { %p468_p6 = pnand %p466_p3, %p452_p5  ;;  %p474_p4 = scmp.lt.s32.totalorder %s472_s3, %s465_s20 }
  0x2a   : > { %p469_p11 = pneg %p468_p6  ;;  %p475_p10 = por %p474_p4, %p473_p9 }
  0x2c   : > { %p476_p12 = pnand %p475_p10, %p469_p11 }
  0x2e   : > { %479 = shalt.err (!%p476_p12)
}
  0x2f   : > { %390 = dma.hbm_to_vmem [thread:$0]  (!%p698_p0), %s690_s30, 128, %s694_s4, %s134_s6  }
  0x30   : > { %p851_p1 = scmp.lt.s32.totalorder %s596_s14, 3  ;;  %p852_p2 = scmp.ge.s32.totalorder %s596_s14, 1 }
  0x31   : > { %s743_s16 = scalar_lea.hbm %s842_s1, %s368_s27  ;;  %s156_s18 = scalar_lea.vmem [#allocation6], %s367_s26 }
  0x32   : > { %p734_p7 = pnand %p852_p2, %p851_p1  ;;  %s164_s19 = sshll.u32 %s156_s18, 4  ;;  %s165_s19 = int_to_ptr.vmem [resolvable:$true] %s164_s19 }
  0x33   : > { %s153_s30 = scalar_lea.sflag [#allocation7], %s681_s25  ;;  %s480_s4 = scalar_lea.hbm %s743_s16, 128 }
  0x34   : > { %s853_s7 = scalar_select %p734_p7, 1, 0 }
  0x35   : > { %p481_p9 = scmp.ne.s32.totalorder %s743_s16, %s480_s4  ;;  %s485_s27 = scalar_lea.hbm %s842_s1, 256 }
  0x36   : > { %p486_p3 = scmp.lt.u32.totalorder %s743_s16, %s842_s1  ;;  %p487_p6 = scmp.lt.u32.totalorder %s485_s27, %s480_s4 }
  0x37   : > { %p483_p11 = pnand %p481_p9, %p452_p5  ;;  %p489_p10 = scmp.lt.u32.totalorder %s480_s4, %s743_s16 }
  0x38   : > { %p488_p4 = por %p487_p6, %p486_p3 }
  0x39   : > { %p484_p13 = pneg %p483_p11 }
  0x3a   : > { %p490_p12 = por %p489_p10, %p488_p4 }
  0x3c   : > { %p491_p1 = pnand %p490_p12, %p484_p13 }
  0x3e   : > { %494 = shalt.err (!%p491_p1)
}
  0x3f   : > { %s495_s25 = scalar_lea.vmem %s165_s19, 128  ;;  %s599_s26 = smov [#allocation6]  }
  0x40   : > { %p496_p2 = scmp.ne.s32.totalorder %s165_s19, %s495_s25  ;;  %s500_s3 = sshll.u32 %s599_s26, 4  ;;  %s501_s3 = int_to_ptr.vmem [resolvable:$false] %s500_s3 }
  0x41   : > { %s502_s8 = scalar_lea.vmem %s501_s3, 256  ;;  %p503_p8 = scmp.lt.s32.totalorder %s165_s19, %s501_s3 }
  0x42   : > { %p498_p9 = pnand %p496_p2, %p452_p5  ;;  %p504_p7 = scmp.lt.s32.totalorder %s502_s8, %s495_s25 }
  0x44   : > { %p499_p11 = pneg %p498_p9  ;;  %p505_p3 = por %p504_p7, %p503_p8 }
  0x46   : > { %p506_p6 = pnand %p505_p3, %p499_p11 }
  0x48   : > { %509 = shalt.err (!%p506_p6)
}
  0x49   : > { %393 = dma.hbm_to_vmem [thread:$0]  (!%p698_p0), %s743_s16, 128, %s165_s19, %s153_s30  }
  0x4a   : > { %p854_p13 = scmp.ne.s32.totalorder %s853_s7, 0 }
  0x4b   : > { %s770_s15 = sand.u32 (!%p854_p13), 1, %s580_s10   ;;  %p855_p8 = scmp.ne.s32.totalorder (!%p854_p13), %s847_s21, 0 }
  0x4c   : > { %173 = sbr.rel (%p854_p13) target bundleno = 327 (0x147), region = 28  ;;  %s773_s18 = sshll.u32 (!%p854_p13), %s770_s15, 3 }
  0x4d   : > { %s176_s4 = scalar_lea.sflag (!%p854_p13), [#allocation4], %s770_s15  ;;  %s179_s6 = scalar_lea.vmem (!%p854_p13), [#allocation3], %s773_s18 }
  0x53   : > { %563 = dma.done.wait (%p855_p8), %s176_s4, 128  }
  0x54   : > { %565 = vsyncadd (%p855_p8), %s176_s4, 4294967168  ;;  %s185_s5 = scalar_lea.sflag [#allocation7], %s770_s15  ;;  %s188_s7 = scalar_lea.vmem [#allocation6], %s773_s18 }
  0x55   : > { %567 = dma.done.wait (%p855_p8), %s185_s5, 128  }
  0x56   : > { %569 = vsyncadd (%p855_p8), %s185_s5, 4294967168  ;;  %v219_v0 = vld [vmem:[%s179_s6] sm:$0xff]  ;;  %v220_v1 = vld [vmem:[%s188_s7] sm:$0xff]  ;;  %s376_s21 = sshll.u32 %s588_s12, 7  ;;  %s213_s19 = scalar_lea.vmem [#allocation8], %s773_s18 }
  0x57   : > { %v221_v2 = vsub.f32 %v219_v0, %v220_v1  ;;  %s260_s30 = sshll.u32 %s213_s19, 4  ;;  %s792_s28 = scalar_lea.hbm %s843_s2, %s376_s21  ;;  %s794_s30 = int_to_ptr.vmem [resolvable:$true] %s260_s30 }
  0x58   : > { %s247_s29 = scalar_lea.sflag [#allocation5], %s770_s15  ;;  %s510_s25 = scalar_lea.vmem %s794_s30, 128 }
  0x59   : > { %v222_v3 = vmul.f32 %v221_v2, %v221_v2  ;;  %p511_p0 = scmp.ne.s32.totalorder %s794_s30, %s510_s25  ;;  %p856_p5 = scmp.ne.s32.totalorder %s848_s22, 0 }
  0x5a   : > { %s600_s12 = smov [#allocation8]  }
  0x5b   : > { %231 = vadd.xlane.f32.xlu0 %v222_v3  ;;  %p512_p7 = pnand %p511_p0, %p856_p5  ;;  %s514_s26 = sshll.u32 %s600_s12, 4  ;;  %s515_s26 = int_to_ptr.vmem [resolvable:$false] %s514_s26 }
  0x5c   : > { %s516_s3 = scalar_lea.vmem %s515_s26, 256  ;;  %p517_p10 = scmp.lt.s32.totalorder %s794_s30, %s515_s26 }
  0x5d   : > { %p513_p4 = pneg %p512_p7  ;;  %p518_p12 = scmp.lt.s32.totalorder %s516_s3, %s510_s25 }
  0x5f   : > { %p519_p1 = por %p518_p12, %p517_p10 }
  0x61   : > { %p520_p2 = pnand %p519_p1, %p513_p4 }
  0xe8   : > { %v232_v4 = vpop.xlane.xlu0 %231 }
  0xe9   : > { %v233_v5 = vrot.slane %v232_v4, 4 }
  0xeb   : > { %v234_v6 = vadd.f32 %v233_v5, %v232_v4 }
  0xed   : > { %v235_v7 = vrot.slane %v234_v6, 2 }
  0xef   : > { %v236_v8 = vadd.f32 %v235_v7, %v234_v6 }
  0xf1   : > { %v237_v9 = vrot.slane %v236_v8, 1 }
  0xf3   : > { %v238_v10 = vadd.f32 %v237_v9, %v236_v8 }
  0xf5   : > { %379 = vpush %v238_v10 }
 0x126   : > { %s380_s16 = spop %379 }
 0x127   : > { %v240_v11 = vstv %s380_s16 }
 0x128   : > { %v241_v12 = vmul.f32 0.0009765625, %v240_v11 }
 0x12a   : > { %v242_v13 = vadd.f32 1e-08, %v241_v12 }
 0x12c   : > { %448 = vlog2.f32 %v242_v13 }
 0x136   : > { %v449_v14 = vpop.eup %448 }
 0x137   : > { %v244_v15 = vmul.f32 0.6931472, %v449_v14 }
 0x139   : > { %245 = vst [vmem:[%s213_s19] sm:$0xff] %v244_v15 }
 0x13a   : > { %523 = shalt.err (!%p520_p2)
}
 0x13b   : > { %s524_s8 = scalar_lea.hbm %s792_s28, 128  ;;  %s528_s4 = scalar_lea.hbm %s843_s2, 256 }
 0x13c   : > { %p525_p9 = scmp.ne.s32.totalorder %s792_s28, %s524_s8  ;;  %p529_p6 = scmp.lt.u32.totalorder %s792_s28, %s843_s2 }
 0x13d   : > { %p530_p13 = scmp.lt.u32.totalorder %s528_s4, %s524_s8  ;;  %p532_p0 = scmp.lt.u32.totalorder %s524_s8, %s792_s28 }
 0x13e   : > { %p526_p11 = pnand %p525_p9, %p856_p5 }
 0x13f   : > { %p531_p8 = por %p530_p13, %p529_p6 }
 0x140   : > { %p527_p3 = pneg %p526_p11 }
 0x141   : > { %p533_p7 = por %p532_p0, %p531_p8 }
 0x143   : > { %p534_p4 = pnand %p533_p7, %p527_p3 }
 0x145   : > { %537 = shalt.err (!%p534_p4)
}
 0x146   : > { %385 = dma.vmem_to_hbm [thread:$0]  (%p856_p5), %s794_s30, 128, %s792_s28, %s247_s29  }
 0x147 PF: > { %s272_s7 = sand.u32 1, %s576_s9   ;;  %p857_p10 = scmp.ne.s32.totalorder %s849_s24, 0 }
 0x148   : > { %p858_p12 = scmp.ge.s32.totalorder %s596_s14, 2  ;;  %s273_s16 = scalar_lea.sflag [#allocation5], %s272_s7 }
 0x14a   : > { %p395_p1 = pnand %p858_p12, %p857_p10 }
 0x14c   : > { %571 = dma.done.wait (!%p395_p1), %s273_s16, 128  }
 0x14d   : > { %573 = vsyncadd (!%p395_p1), %s273_s16, 4294967168  ;;  %s21_s14 = sadd.s32 1, %s596_s14   ;;  %s859_s9 = smov %s580_s10 }
 0x14e   : > { %p18_p2 = scmp.ge.s32.totalorder %s21_s14, 4   ;;  %s860_s10 = smov %s584_s11 }
 0x14f   : > { %s861_s11 = smov %s672_s23  ;;  %s862_s12 = smov %s592_s13 }
 0x150   : > { %s863_s13 = smov %s865_s17  ;;  %20 = sbr.rel (!%p18_p2) target bundleno = 8 (0x8), region = 94 }
 0x157   :  { %278 = vsyncpa [#allocation4], 1 }
 0x158   :  { %280 = vsyncpa [#allocation4 + $0x1], 1 }
 0x159   :  { %281 = vsyncpa [#allocation7], 1 }
 0x15a   :  { %283 = vsyncpa [#allocation7 + $0x1], 1 }
 0x15b   :  { %284 = vsyncpa [#allocation5], 1 }
 0x15c   :  { %286 = vsyncpa [#allocation5 + $0x1], 1 }

</bundles_post_ra>
